<compile_context>
chip_gen: v7x
topology: tpu7x:2x2x1
jax: 0.10.0
libtpu: 0.0.40
codegen_flags: <defaults>
</compile_context>

<pallas_src>
import functools
import math

import jax
import jax.numpy as jnp
import numpy as np
from jax import lax
from jax.experimental import pallas as pl
from jax.experimental.pallas import tpu as pltpu


# ---------------------------------------------------------------------------
# VMEM budget / tile helpers
# ---------------------------------------------------------------------------

@functools.lru_cache(maxsize=None)
def _vmem_limit_bytes():
    """Per-generation scoped-VMEM limit: ~75% of physical VMEM
    (v5e/v6e -> ~96 MiB, v7x -> ~48 MiB); conservative 48 MiB fallback."""
    try:
        cap = int(pltpu.get_tpu_info().vmem_capacity_bytes)
    except Exception:  # interpret mode / CPU AOT compile
        cap = 64 * 1024 * 1024
    return min(int(cap * 0.75), 100 * 1024 * 1024)


def _weight_resident_budget():
    # Budget for a double-buffered, fully-resident (K, tn) weight block.
    return _vmem_limit_bytes() // 3


def _lane_tile(dim, pref):
    """Last-dim tile: the full dim, or the largest multiple of 128 <= pref dividing dim."""
    if dim <= pref or dim % 128 != 0:
        return dim
    t = (pref // 128) * 128
    while t >= 128:
        if dim % t == 0:
            return t
        t -= 128
    return dim


def _sublane_tile(dim, pref):
    """Second-minor-dim tile: the full dim, or the largest multiple of 8 <= pref dividing dim."""
    if dim <= pref:
        return dim
    t = (pref // 8) * 8
    while t >= 8:
        if dim % t == 0:
            return t
        t -= 8
    return dim


# ---------------------------------------------------------------------------
# Pallas kernels
# ---------------------------------------------------------------------------

def matmul_kernel(x_ref, w_ref, b_ref, o_ref, acc_ref, *, act, compute_dtype):
    """Tiled y = x @ w + b (w already (K, N)), optional exact-erf GELU.
    MXU operands cast to compute_dtype (bf16 on request), accumulation in f32."""
    @pl.when(pl.program_id(2) == 0)
    def _init():
        acc_ref[...] = jnp.zeros_like(acc_ref)

    acc_ref[...] += jnp.dot(x_ref[...].astype(compute_dtype),
                            w_ref[...].astype(compute_dtype),
                            preferred_element_type=jnp.float32)

    @pl.when(pl.program_id(2) == pl.num_programs(2) - 1)
    def _finalize():
        y = acc_ref[...] + b_ref[...].astype(jnp.float32)
        if act == "gelu":
            # exact erf GELU, matching the reference python `gelu`
            y = y * 0.5 * (1.0 + lax.erf(y * (1.0 / math.sqrt(2.0))))
        o_ref[...] = y.astype(o_ref.dtype)


def dense_add_ln_kernel(x_ref, w_ref, b_ref, res_ref, g_ref, beta_ref,
                        o_ref, acc_ref, *, eps, compute_dtype):
    """Fused: y = LayerNorm(x @ w + b + residual) with TF-style eps (f32 LN math)."""
    @pl.when(pl.program_id(1) == 0)
    def _init():
        acc_ref[...] = jnp.zeros_like(acc_ref)

    acc_ref[...] += jnp.dot(x_ref[...].astype(compute_dtype),
                            w_ref[...].astype(compute_dtype),
                            preferred_element_type=jnp.float32)

    @pl.when(pl.program_id(1) == pl.num_programs(1) - 1)
    def _finalize():
        y = acc_ref[...] + b_ref[...].astype(jnp.float32) + res_ref[...].astype(jnp.float32)
        u = jnp.mean(y, axis=-1, keepdims=True)
        s = jnp.mean((y - u) ** 2, axis=-1, keepdims=True)
        yn = (y - u) * lax.rsqrt(s + eps)
        o_ref[...] = (g_ref[...].astype(jnp.float32) * yn
                      + beta_ref[...].astype(jnp.float32)).astype(o_ref.dtype)


def attn_kernel(*refs, group, hd, scale, split_qkv, return_att, compute_dtype):
    """Multi-head attention for one (batch, head-group) grid step.

    split_qkv=True : Q/K/V head-group chunks arrive as separate 128-lane-aligned
                     DMA'd blocks (1, S, group*hd).
    split_qkv=False: fallback (tiny qkv) -- one fused (1, S, 3*qkv) block, heads
                     sliced in-kernel with static offsets.
    ctx block (1, S, group*hd) is written head-by-head (no concat);
    optional att block is (1, group, S, S) pre-softmax scores (incl. mask).
    """
    if split_qkv:
        q_ref, k_ref, v_ref, mask_ref = refs[:4]
        out_refs = refs[4:]
    else:
        qkv_ref, mask_ref = refs[:2]
        out_refs = refs[2:]
    ctx_ref = out_refs[0]
    att_ref = out_refs[1] if return_att else None

    m = mask_ref[0, 0]          # (1, S), additive mask, broadcasts over query rows
    all_hd = group * hd         # fused-path Q/K/V stride (== qkv_size there)

    for j in range(group):      # static unroll; liveness bounded to one head
        if split_qkv:
            q = q_ref[0, :, j * hd:(j + 1) * hd]
            k = k_ref[0, :, j * hd:(j + 1) * hd]
            v = v_ref[0, :, j * hd:(j + 1) * hd]
        else:
            q = qkv_ref[0, :, j * hd:(j + 1) * hd]
            k = qkv_ref[0, :, all_hd + j * hd: all_hd + (j + 1) * hd]
            v = qkv_ref[0, :, 2 * all_hd + j * hd: 2 * all_hd + (j + 1) * hd]

        # q @ k^T without an explicit transpose: contract last dims on the MXU.
        s = lax.dot_general(q.astype(compute_dtype), k.astype(compute_dtype),
                            (((1,), (1,)), ((), ())),
                            preferred_element_type=jnp.float32)
        s = s * scale + m
        if return_att:
            att_ref[0, j] = s.astype(att_ref.dtype)

        # numerically-stable EXACT softmax (approx reciprocal removed: it caused
        # the previous layer_out tolerance failure).
        s_max = jnp.max(s, axis=-1, keepdims=True)
        e = jnp.exp(s - s_max)
        p = e / jnp.sum(e, axis=-1, keepdims=True)
        # dropout(attention_probs) is identity in eval mode.
        ctx = jnp.dot(p.astype(compute_dtype), v.astype(compute_dtype),
                      preferred_element_type=jnp.float32)
        # per-head direct store into the ctx block (no jnp.concatenate).
        ctx_ref[0, :, j * hd:(j + 1) * hd] = ctx.astype(ctx_ref.dtype)


# ---------------------------------------------------------------------------
# Pallas wrappers
# ---------------------------------------------------------------------------

def linear_pallas(x2d, w_kn, b, act=None, *, compute_dtype=jnp.float32,
                  tm=512, tn=1024, tk=None):
    M, K = x2d.shape
    K2, N = w_kn.shape
    assert K == K2
    tm = _sublane_tile(M, tm)
    tn = _lane_tile(N, tn)
    if tk is None:
        # Full-K contraction (weight block fully resident, no k-loop) when the
        # double-buffered weight block fits the budget; otherwise tile K.
        w_block_bytes = 2 * K * tn * w_kn.dtype.itemsize
        tk = K if w_block_bytes <= _weight_resident_budget() else 512
    tk = _lane_tile(K, tk)
    grid = (M // tm, N // tn, K // tk)
    # TODO(synk): if profiling shows exposed weight DMA in the k-loop, add
    # pipeline_mode=pl.Buffered(3) to the weight BlockSpec.
    return pl.pallas_call(
        functools.partial(matmul_kernel, act=act, compute_dtype=compute_dtype),
        out_shape=jax.ShapeDtypeStruct((M, N), jnp.float32),
        grid=grid,
        in_specs=[
            pl.BlockSpec((tm, tk), lambda i, j, k: (i, k)),
            pl.BlockSpec((tk, tn), lambda i, j, k: (k, j)),
            pl.BlockSpec((1, tn), lambda i, j, k: (0, j)),
        ],
        out_specs=pl.BlockSpec((tm, tn), lambda i, j, k: (i, j)),
        scratch_shapes=[pltpu.VMEM((tm, tn), jnp.float32)],
        compiler_params=pltpu.CompilerParams(
            dimension_semantics=("parallel", "parallel", "arbitrary"),
            vmem_limit_bytes=_vmem_limit_bytes()),
    )(x2d, w_kn, b.reshape(1, N))


def dense_add_ln_pallas(x2d, w_kn, b, res2d, gamma, beta, eps, *,
                        compute_dtype=jnp.float32, tm=512, tk=None):
    M, K = x2d.shape
    K2, H = w_kn.shape
    assert K == K2
    tm = _sublane_tile(M, tm)
    if tk is None:
        w_block_bytes = 2 * K * H * w_kn.dtype.itemsize
        tk = K if w_block_bytes <= _weight_resident_budget() else 512
    tk = _lane_tile(K, tk)
    grid = (M // tm, K // tk)
    return pl.pallas_call(
        functools.partial(dense_add_ln_kernel, eps=eps, compute_dtype=compute_dtype),
        out_shape=jax.ShapeDtypeStruct((M, H), jnp.float32),
        grid=grid,
        in_specs=[
            pl.BlockSpec((tm, tk), lambda i, k: (i, k)),
            pl.BlockSpec((tk, H), lambda i, k: (k, 0)),
            pl.BlockSpec((1, H), lambda i, k: (0, 0)),
            pl.BlockSpec((tm, H), lambda i, k: (i, 0)),
            pl.BlockSpec((1, H), lambda i, k: (0, 0)),
            pl.BlockSpec((1, H), lambda i, k: (0, 0)),
        ],
        out_specs=pl.BlockSpec((tm, H), lambda i, k: (i, 0)),
        scratch_shapes=[pltpu.VMEM((tm, H), jnp.float32)],
        compiler_params=pltpu.CompilerParams(
            dimension_semantics=("parallel", "arbitrary"),
            vmem_limit_bytes=_vmem_limit_bytes()),
    )(x2d, w_kn, b.reshape(1, H), res2d, gamma.reshape(1, H), beta.reshape(1, H))


def attention_pallas(qkv, attention_mask, nh, hd, *, return_att=True,
                     compute_dtype=jnp.float32, att_dtype=jnp.float32):
    B, S, three_qkv = qkv.shape
    qkv_size = nh * hd
    assert three_qkv == 3 * qkv_size
    scale = 1.0 / math.sqrt(hd)

    # Smallest head group whose lane width (group*hd) is a multiple of 128 so the
    # Q/K/V head chunks can be DMA-sliced by BlockSpec (e.g. 2 heads at hd=64) and
    # the layer_att out block stays (1, group, S, S) -- flat in nh (v7x VMEM safe).
    # If no such group exists (tiny qkv configs like this test), fall back to one
    # fused full-width block per batch with in-kernel static head slicing.
    group = None
    for g in range(1, nh + 1):
        if nh % g == 0 and (g * hd) % 128 == 0:
            group = g
            break
    split_qkv = group is not None
    if not split_qkv:
        group = nh
    n_groups = nh // group
    grid = (B, n_groups)

    if split_qkv:
        blk = group * hd
        in_specs = [
            pl.BlockSpec((1, S, blk), lambda b, g: (b, 0, g)),                 # Q chunk
            pl.BlockSpec((1, S, blk), lambda b, g: (b, 0, n_groups + g)),      # K chunk
            pl.BlockSpec((1, S, blk), lambda b, g: (b, 0, 2 * n_groups + g)),  # V chunk
            pl.BlockSpec((1, 1, 1, S), lambda b, g: (b, 0, 0, 0)),
        ]
        inputs = (qkv, qkv, qkv, attention_mask)
    else:
        in_specs = [
            pl.BlockSpec((1, S, 3 * qkv_size), lambda b, g: (b, 0, 0)),
            pl.BlockSpec((1, 1, 1, S), lambda b, g: (b, 0, 0, 0)),
        ]
        inputs = (qkv, attention_mask)

    out_shapes = [jax.ShapeDtypeStruct((B, S, qkv_size), jnp.float32)]
    out_specs = [pl.BlockSpec((1, S, group * hd), lambda b, g: (b, 0, g))]
    if return_att:
        out_shapes.append(jax.ShapeDtypeStruct((B, nh, S, S), att_dtype))
        out_specs.append(pl.BlockSpec((1, group, S, S), lambda b, g: (b, g, 0, 0)))

    outs = pl.pallas_call(
        functools.partial(attn_kernel, group=group, hd=hd, scale=scale,
                          split_qkv=split_qkv, return_att=return_att,
                          compute_dtype=compute_dtype),
        out_shape=tuple(out_shapes),
        grid=grid,
        in_specs=in_specs,
        out_specs=tuple(out_specs),
        compiler_params=pltpu.CompilerParams(
            dimension_semantics=("parallel", "parallel"),
            vmem_limit_bytes=_vmem_limit_bytes()),
    )(*inputs)
    if return_att:
        return outs[0], outs[1]
    return outs[0], None


# ---------------------------------------------------------------------------
# One-time parameter preparation (hoisted out of the forward path)
# ---------------------------------------------------------------------------

def prepare_params(params, weight_dtype=jnp.float32):
    """Re-layout torch-style (out, in) weights to (in, out), fuse Q/K/V along the
    out dim, and optionally store weights in bf16 (halves HBM weight traffic and
    feeds the MXU its native operand dtype).  Call ONCE at parameter-build time."""
    f32 = jnp.float32
    wqkv = jnp.concatenate([params["q_w"], params["k_w"], params["v_w"]], axis=0)
    bqkv = jnp.concatenate([params["q_b"], params["k_b"], params["v_b"]], axis=0)
    return {
        "wqkv": wqkv.T.astype(weight_dtype), "bqkv": bqkv.astype(f32),
        "ao_w": params["ao_w"].T.astype(weight_dtype), "ao_b": params["ao_b"].astype(f32),
        "ln1_g": params["ln1_g"].astype(f32), "ln1_b": params["ln1_b"].astype(f32),
        "i_w": params["i_w"].T.astype(weight_dtype), "i_b": params["i_b"].astype(f32),
        "o_w": params["o_w"].T.astype(weight_dtype), "o_b": params["o_b"].astype(f32),
        "ln2_g": params["ln2_g"].astype(f32), "ln2_b": params["ln2_b"].astype(f32),
    }


# ---------------------------------------------------------------------------
# SuperBertLayer forward (sample dims == super dims)
# ---------------------------------------------------------------------------

def super_bert_layer_forward(hidden_states, attention_mask, prepared, cfg, *,
                             return_att=True, compute_dtype=jnp.float32,
                             att_dtype=jnp.float32):
    # TODO(synk): in_index/out_index gather-based "Super" sub-network sampling is
    # not implemented; sample dims == super dims (identity sampling).
    B, S, H = hidden_states.shape
    NH = cfg["num_attention_heads"]
    QKV = cfg["qkv_size"]
    HD = QKV // NH
    eps = cfg["layer_norm_eps"]

    x2d = hidden_states.reshape(B * S, H)

    # --- SuperBertSelfAttention: fused QKV projection (one matmul, one x read) ---
    qkv2d = linear_pallas(x2d, prepared["wqkv"], prepared["bqkv"],
                          compute_dtype=compute_dtype)
    qkv = qkv2d.reshape(B, S, 3 * QKV)              # pure reshape, no transpose

    ctx, layer_att = attention_pallas(qkv, attention_mask, NH, HD,
                                      return_att=return_att,
                                      compute_dtype=compute_dtype,
                                      att_dtype=att_dtype)
    ctx2d = ctx.reshape(B * S, QKV)

    # --- SuperBertSelfOutput: dense + dropout(id) + add + LayerNorm, fused ---
    attn_out = dense_add_ln_pallas(ctx2d, prepared["ao_w"], prepared["ao_b"],
                                   x2d, prepared["ln1_g"], prepared["ln1_b"], eps,
                                   compute_dtype=compute_dtype)

    # --- SuperBertIntermediate: dense + exact-erf GELU ---
    inter = linear_pallas(attn_out, prepared["i_w"], prepared["i_b"], act="gelu",
                          compute_dtype=compute_dtype)

    # --- SuperBertOutput: dense + dropout(id) + add + LayerNorm, fused ---
    layer_out = dense_add_ln_pallas(inter, prepared["o_w"], prepared["o_b"],
                                    attn_out, prepared["ln2_g"], prepared["ln2_b"], eps,
                                    compute_dtype=compute_dtype)

    return layer_out.reshape(B, S, H), layer_att


# ---------------------------------------------------------------------------
# Pure-JAX reference for validation
# ---------------------------------------------------------------------------

def reference_forward(hidden_states, attention_mask, params, cfg):
    B, S, H = hidden_states.shape
    NH = cfg["num_attention_heads"]
    QKV = cfg["qkv_size"]
    HD = QKV // NH
    eps = cfg["layer_norm_eps"]

    def lin(x, w, b):
        return x @ w.T + b

    def gelu(x):
        return x * 0.5 * (1.0 + lax.erf(x / math.sqrt(2.0)))

    def ln(x, g, b):
        u = jnp.mean(x, -1, keepdims=True)
        s = jnp.mean((x - u) ** 2, -1, keepdims=True)
        return g * ((x - u) / jnp.sqrt(s + eps)) + b

    q = lin(hidden_states, params["q_w"], params["q_b"])
    k = lin(hidden_states, params["k_w"], params["k_b"])
    v = lin(hidden_states, params["v_w"], params["v_b"])

    def split(t):
        return t.reshape(B, S, NH, HD).transpose(0, 2, 1, 3)

    qh, kh, vh = split(q), split(k), split(v)
    scores = jnp.einsum("bhqd,bhkd->bhqk", qh, kh) / math.sqrt(HD)
    scores = scores + attention_mask
    probs = jax.nn.softmax(scores, axis=-1)
    ctx = jnp.einsum("bhqk,bhkd->bhqd", probs, vh)
    ctx = ctx.transpose(0, 2, 1, 3).reshape(B, S, QKV)

    attn_out = ln(lin(ctx, params["ao_w"], params["ao_b"]) + hidden_states,
                  params["ln1_g"], params["ln1_b"])
    inter = gelu(lin(attn_out, params["i_w"], params["i_b"]))
    layer_out = ln(lin(inter, params["o_w"], params["o_b"]) + attn_out,
                   params["ln2_g"], params["ln2_b"])
    return layer_out, scores


# ---------------------------------------------------------------------------
# Main
# ---------------------------------------------------------------------------

if __name__ == "__main__":
    cfg = dict(
        hidden_size=32,
        qkv_size=32,
        num_attention_heads=4,
        intermediate_size=64,
        layer_norm_eps=1e-12,
    )
    B, S = 2, 8
    H, QKV, I = cfg["hidden_size"], cfg["qkv_size"], cfg["intermediate_size"]

    key = jax.random.PRNGKey(0)
    keys = jax.random.split(key, 12)

    def xavier(k, shape):
        fan_out, fan_in = shape
        lim = math.sqrt(6.0 / (fan_in + fan_out))
        return jax.random.uniform(k, shape, jnp.float32, -lim, lim)

    params = {
        "q_w": xavier(keys[0], (QKV, H)), "q_b": jnp.zeros((QKV,), jnp.float32),
        "k_w": xavier(keys[1], (QKV, H)), "k_b": jnp.zeros((QKV,), jnp.float32),
        "v_w": xavier(keys[2], (QKV, H)), "v_b": jnp.zeros((QKV,), jnp.float32),
        "ao_w": xavier(keys[3], (H, QKV)), "ao_b": jnp.zeros((H,), jnp.float32),
        "ln1_g": jnp.ones((H,), jnp.float32), "ln1_b": jnp.zeros((H,), jnp.float32),
        "i_w": xavier(keys[4], (I, H)), "i_b": jnp.zeros((I,), jnp.float32),
        "o_w": xavier(keys[5], (H, I)), "o_b": jnp.zeros((H,), jnp.float32),
        "ln2_g": jnp.ones((H,), jnp.float32), "ln2_b": jnp.zeros((H,), jnp.float32),
    }

    hidden_states = jax.random.normal(keys[6], (B, S, H), jnp.float32)
    # additive BERT mask: last 2 positions of batch 1 masked out
    pad = jnp.zeros((B, S), jnp.float32).at[1, -2:].set(1.0)
    attention_mask = (pad * -10000.0).reshape(B, 1, 1, S)

    # One-time weight re-layout (hoisted out of the forward path).
    prep_f32 = prepare_params(params, jnp.float32)

    # f32 path: exact semantics, tight check against the reference.
    layer_out, layer_att = super_bert_layer_forward(
        hidden_states, attention_mask, prep_f32, cfg,
        return_att=True, compute_dtype=jnp.float32)
    jax.block_until_ready((layer_out, layer_att))

    ref_out, ref_att = reference_forward(hidden_states, attention_mask, params, cfg)
    np.testing.assert_allclose(np.asarray(layer_att), np.asarray(ref_att),
                               rtol=2e-3, atol=2e-3)
    np.testing.assert_allclose(np.asarray(layer_out), np.asarray(ref_out),
                               rtol=2e-3, atol=2e-3)

    # bf16-MXU-operand path (weights pre-cast once, f32 accumulation / LN math),
    # return_att=False (inference path): loose tolerance check.
    prep_bf16 = prepare_params(params, jnp.bfloat16)
    layer_out_bf16, _ = super_bert_layer_forward(
        hidden_states, attention_mask, prep_bf16, cfg,
        return_att=False, compute_dtype=jnp.bfloat16)
    jax.block_until_ready(layer_out_bf16)
    np.testing.assert_allclose(np.asarray(layer_out_bf16), np.asarray(ref_out),
                               rtol=1e-1, atol=1e-1)

    print("KERNEL_OK")
</pallas_src>

<mosaic_0001>
module attributes {stable_mosaic.version = 11 : i64} {
  func.func @matmul_kernel(%arg0: i32, %arg1: i32, %arg2: i32, %arg3: memref<16x32xf32, #tpu.memory_space<vmem>>, %arg4: memref<32x96xf32, #tpu.memory_space<vmem>>, %arg5: memref<1x96xf32, #tpu.memory_space<vmem>>, %arg6: memref<16x96xf32, #tpu.memory_space<vmem>>, %arg7: memref<16x96xf32, #tpu.memory_space<vmem>>) attributes {dimension_semantics = [#tpu.dimension_semantics<parallel>, #tpu.dimension_semantics<parallel>, #tpu.dimension_semantics<arbitrary>], iteration_bounds = array<i64: 1, 1, 1>, scalar_prefetch = 0 : i64, scratch_operands = 1 : i64, tpu.core_type = #tpu.core_type<tc>, window_params = [{transform_indices = @transform_0, window_bounds = array<i64: 16, 32>}, {transform_indices = @transform_1, window_bounds = array<i64: 32, 96>}, {transform_indices = @transform_2, window_bounds = array<i64: 1, 96>}, {transform_indices = @transform_3, window_bounds = array<i64: 16, 96>}]} {
    %c0_i32 = arith.constant 0 : i32
    %0 = arith.cmpi eq, %arg2, %c0_i32 : i32
    %1 = arith.extui %0 : i1 to i32
    %c0_i32_0 = arith.constant 0 : i32
    %2 = arith.cmpi ne, %1, %c0_i32_0 : i32
    scf.if %2 {
      %cst_10 = arith.constant 0.000000e+00 : f32
      %12 = vector.broadcast %cst_10 : f32 to vector<16x96xf32>
      %c0_11 = arith.constant 0 : index
      %c0_12 = arith.constant 0 : index
      %13 = vector.load %arg7[%c0_11, %c0_12] : memref<16x96xf32, #tpu.memory_space<vmem>>, vector<16x96xf32>
      tpu.vector_store %arg7[%c0_11, %c0_12], %12 {strides = array<i32>} : memref<16x96xf32, #tpu.memory_space<vmem>>, vector<16x96xf32>,
    } else {
    }
    %c0 = arith.constant 0 : index
    %c0_1 = arith.constant 0 : index
    %3 = vector.load %arg7[%c0, %c0_1] : memref<16x96xf32, #tpu.memory_space<vmem>>, vector<16x96xf32>
    %c0_2 = arith.constant 0 : index
    %c0_3 = arith.constant 0 : index
    %4 = vector.load %arg3[%c0_2, %c0_3] : memref<16x32xf32, #tpu.memory_space<vmem>>, vector<16x32xf32>
    %c0_4 = arith.constant 0 : index
    %c0_5 = arith.constant 0 : index
    %5 = vector.load %arg4[%c0_4, %c0_5] : memref<32x96xf32, #tpu.memory_space<vmem>>, vector<32x96xf32>
    %cst = arith.constant dense<0.000000e+00> : vector<16x96xf32>
    %6 = tpu.matmul %4, %5, %cst {dimension_numbers = #tpu.dot_dimension_numbers<[1], [0], [0], [1], [0, 0, 1, 1], [], []>} : vector<16x32xf32>, vector<32x96xf32>, vector<16x96xf32> -> vector<16x96xf32>
    %7 = arith.addf %3, %6 : vector<16x96xf32>
    %c0_6 = arith.constant 0 : index
    %c0_7 = arith.constant 0 : index
    %8 = vector.load %arg7[%c0_6, %c0_7] : memref<16x96xf32, #tpu.memory_space<vmem>>, vector<16x96xf32>
    tpu.vector_store %arg7[%c0_6, %c0_7], %7 {strides = array<i32>} : memref<16x96xf32, #tpu.memory_space<vmem>>, vector<16x96xf32>,
    %c0_i32_8 = arith.constant 0 : i32
    %9 = arith.cmpi eq, %arg2, %c0_i32_8 : i32
    %10 = arith.extui %9 : i1 to i32
    %c0_i32_9 = arith.constant 0 : i32
    %11 = arith.cmpi ne, %10, %c0_i32_9 : i32
    scf.if %11 {
      %c0_10 = arith.constant 0 : index
      %c0_11 = arith.constant 0 : index
      %12 = vector.load %arg7[%c0_10, %c0_11] : memref<16x96xf32, #tpu.memory_space<vmem>>, vector<16x96xf32>
      %c0_12 = arith.constant 0 : index
      %c0_13 = arith.constant 0 : index
      %13 = vector.load %arg5[%c0_12, %c0_13] : memref<1x96xf32, #tpu.memory_space<vmem>>, vector<1x96xf32>
      %14 = vector.broadcast %13 : vector<1x96xf32> to vector<16x96xf32>
      %15 = arith.addf %12, %14 : vector<16x96xf32>
      %c0_14 = arith.constant 0 : index
      %c0_15 = arith.constant 0 : index
      %16 = vector.load %arg6[%c0_14, %c0_15] : memref<16x96xf32, #tpu.memory_space<vmem>>, vector<16x96xf32>
      tpu.vector_store %arg6[%c0_14, %c0_15], %15 {strides = array<i32>} : memref<16x96xf32, #tpu.memory_space<vmem>>, vector<16x96xf32>,
    } else {
    }
    return
  }
  func.func @transform_0(%arg0: i32, %arg1: i32, %arg2: i32) -> (i32, i32) {
    %c0_i32 = arith.constant 0 : i32
    return %arg0, %arg2 : i32, i32
  }
  func.func @transform_1(%arg0: i32, %arg1: i32, %arg2: i32) -> (i32, i32) {
    %c0_i32 = arith.constant 0 : i32
    return %arg2, %arg1 : i32, i32
  }
  func.func @transform_2(%arg0: i32, %arg1: i32, %arg2: i32) -> (i32, i32) {
    %c0_i32 = arith.constant 0 : i32
    %c0_i32_0 = arith.constant 0 : i32
    return %c0_i32, %arg1 : i32, i32
  }
  func.func @transform_3(%arg0: i32, %arg1: i32, %arg2: i32) -> (i32, i32) {
    %c0_i32 = arith.constant 0 : i32
    return %arg0, %arg1 : i32, i32
  }
}

</mosaic_0001>

<bundles_post_ra>
// kernel: tpu_custom_call.1
= control target key start
LH: loop header
LB: loop body
LE: loop exit
PB: predicated region body
PF: predicated region fallthrough
CT: control target
= control target key end

     0   :  { %8 = vsyncpa [#allocation4], 0  ;;  %s365_s0 = inlined_call_operand.hbm [shape: f32[16,32], index: 0, kind: input, shape index: {}]   ;;  %s366_s1 = inlined_call_operand.hbm [shape: f32[32,96], index: 1, kind: input, shape index: {}]   ;;  %s367_s2 = inlined_call_operand.vmem [shape: f32[1,96], index: 2, kind: input, shape index: {}]   ;;  %s368_s3 = inlined_call_operand.hbm [shape: f32[16,96], index: 3, kind: output, shape index: {}]  }
   0x1   :  { %9 = vsyncpa [#allocation7], 0 }
   0x2   :  { %10 = vsyncpa [#allocation5], 0  ;;  %s285_s12 = smov [#allocation3]   ;;  %s213_s16 = scalar_lea.hbm %s365_s0, 256 }
   0x3   :  { %s16_s13 = sshll.u32 %s285_s12, 4  ;;  %p214_p0 = scmp.ne.s32.totalorder %s365_s0, %s213_s16  ;;  %s17_s13 = int_to_ptr.vmem [resolvable:$true] %s16_s13 }
   0x4   :  { %p217_p1 = scmp.lt.u32.totalorder %s213_s16, %s365_s0 }
   0x6   :  { %p219_p2 = pnand %p217_p1, %p214_p0 }
   0x8   :  { %222 = shalt.err (!%p219_p2)
}
   0x9   :  { %s223_s21 = scalar_lea.vmem %s17_s13, 256  ;;  %p228_p4 = scmp.lt.s32.totalorder %s17_s13, %s17_s13 }
   0xa   :  { %p224_p3 = scmp.ne.s32.totalorder %s17_s13, %s223_s21  ;;  %p229_p5 = scmp.lt.s32.totalorder %s223_s21, %s223_s21 }
   0xc   :  { %p230_p6 = por %p229_p5, %p228_p4 }
   0xe   :  { %p231_p7 = pnand %p230_p6, %p224_p3 }
  0x10   :  { %234 = shalt.err (!%p231_p7)
}
  0x11   :  { %s286_s22 = smov 128   ;;  %s287_s23 = smov 8  }
  0x12   :  { %22 = dma.hbm_to_vmem [thread:$0]  %s365_s0, 256, %s17_s13, [#allocation4], %s286_s22, %s286_s22, %s287_s23  }
  0x13   :  { %s288_s26 = smov [#allocation6]   ;;  %s235_s30 = scalar_lea.hbm %s366_s1, 512 }
  0x14   :  { %s28_s27 = sshll.u32 %s288_s26, 4  ;;  %p236_p8 = scmp.ne.s32.totalorder %s366_s1, %s235_s30  ;;  %s29_s27 = int_to_ptr.vmem [resolvable:$true] %s28_s27 }
  0x15   :  { %p239_p9 = scmp.lt.u32.totalorder %s235_s30, %s366_s1 }
  0x17   :  { %p241_p10 = pnand %p239_p9, %p236_p8 }
  0x19   :  { %244 = shalt.err (!%p241_p10)
}
  0x1a   :  { %s245_s8 = scalar_lea.vmem %s29_s27, 512  ;;  %p250_p12 = scmp.lt.s32.totalorder %s29_s27, %s29_s27 }
  0x1b   :  { %p246_p11 = scmp.ne.s32.totalorder %s29_s27, %s245_s8  ;;  %p251_p13 = scmp.lt.s32.totalorder %s245_s8, %s245_s8 }
  0x1d   :  { %p252_p0 = por %p251_p13, %p250_p12 }
  0x1f   :  { %p253_p1 = pnand %p252_p0, %p246_p11 }
  0x21   :  { %256 = shalt.err (!%p253_p1)
}
  0x22   :  { %34 = dma.hbm_to_vmem [thread:$0]  %s366_s1, 512, %s29_s27, [#allocation7], %s286_s22, %s286_s22, %s287_s23  }
  0x23   :  { %279 = dma.done.wait [#allocation4], 256  }
  0x24   :  { %280 = vsyncadd [#allocation4], 4294967040 }
  0x25   :  { %281 = dma.done.wait [#allocation7], 512  }
  0x26   :  { %282 = vsyncadd [#allocation7], 4294966784  ;;  %vm47_vm0 = vcmask 785408   ;;  %v289_v0 = vmov 0.0   ;;  %vm58_vm1 = vcmask 261120   ;;  %v54_v1 = vld [vmem:[#allocation6] sm:$0xff] }
  0x27   :  { %49 = vst.msk [vmem:[#allocation2 + $0x8] sm:$0xff] %vm47_vm0, %v289_v0  ;;  %48 = vst.msk [vmem:[#allocation2] sm:$0xff] %vm47_vm0, %v289_v0  ;;  %v55_v2 = vld [vmem:[#allocation6 + $0x8] sm:$0xff]  ;;  %v56_v3 = vld [vmem:[#allocation6 + $0x10] sm:$0xff]  ;;  %s290_s11 = smov [#allocation8]  }
  0x28   :  { %v199_v4 = vpack.c.bf16 %v55_v2, %v54_v1  ;;  %v57_v5 = vld [vmem:[#allocation6 + $0x18] sm:$0xff]  ;;  %v52_v6 = vld [vmem:[#allocation3] sm:$0xff]  ;;  %v181_v15 = vld [vmem:[%s367_s2] ss:$0 sm:$0xff]  ;;  %s166_s12 = sshll.u32 %s290_s11, 4  ;;  %s167_s12 = int_to_ptr.vmem [resolvable:$true] %s166_s12 }
  0x29   :  { %v203_v7 = vpack.c.bf16 %v57_v5, %v56_v3  ;;  %196 = vmatprep.mubr.msk.f32.mxu0 %vm58_vm1, %v52_v6  ;;  %v53_v8 = vld [vmem:[#allocation3 + $0x8] sm:$0xff]  ;;  %s257_s13 = scalar_lea.vmem %s167_s12, 256  ;;  %p262_p3 = scmp.lt.s32.totalorder %s167_s12, %s167_s12 }
  0x2a   :  { %200 = vmatprep.subr.bf16.mxu0 %v199_v4  ;;  %p258_p2 = scmp.ne.s32.totalorder %s167_s12, %s257_s13  ;;  %p263_p4 = scmp.lt.s32.totalorder %s257_s13, %s257_s13 }
  0x2b   :  { %202 = vmatpush3.bf16.msra.mxu0 %v199_v4 }
  0x2c   :  { %204 = vmatprep.subr.bf16.mxu0 %v203_v7  ;;  %p264_p5 = por %p263_p4, %p262_p3 }
  0x2e   :  { %v51_v9 = vld [vmem:[#allocation2 + $0x8] sm:$0xff]  ;;  %v50_v10 = vld [vmem:[#allocation2] sm:$0xff]  ;;  %p265_p6 = pnand %p264_p5, %p258_p2 }
  0x2f   :  { %206 = vmatpush3.bf16.msra.mxu0 %v203_v7 }
  0x32   :  { %197 = vmatmul.mubr.msk.f32.vlgmr.msra.gmra.mrb[0].mxu0 %vm58_vm1, %v53_v8 }
 0x105   :  { %v198_v11 = vpop.f32.mrb[0].mxu0 }
 0x106   :  { %v141_v12 = vadd.f32 %v198_v11, %v51_v9  ;;  %v131_v13 = vpop.f32.mrb[1].mxu0 }
 0x107   :  { %v140_v14 = vadd.f32 %v131_v13, %v50_v10 }
 0x108   :  { %144 = vst.msk [vmem:[#allocation2 + $0x8] sm:$0xff] %vm47_vm0, %v141_v12 }
 0x109   :  { %143 = vst.msk [vmem:[#allocation2] sm:$0xff] %vm47_vm0, %v140_v14 }
 0x10f   :  { %v149_v16 = vld [vmem:[#allocation2 + $0x8] sm:$0xff] }
 0x110   :  { %v148_v17 = vld [vmem:[#allocation2] sm:$0xff]  ;;  %v158_v18 = vadd.f32 %v181_v15, %v149_v16 }
 0x111   :  { %v157_v19 = vadd.f32 %v181_v15, %v148_v17 }
 0x112   :  { %160 = vst.msk [vmem:[#allocation8 + $0x8] sm:$0xff] %vm47_vm0, %v158_v18 }
 0x113   :  { %159 = vst.msk [vmem:[#allocation8] sm:$0xff] %vm47_vm0, %v157_v19 }
 0x114   :  { %268 = shalt.err (!%p265_p6)
}
 0x115   :  { %s269_s15 = scalar_lea.hbm %s368_s3, 256 }
 0x116   :  { %p270_p7 = scmp.ne.s32.totalorder %s368_s3, %s269_s15  ;;  %p273_p8 = scmp.lt.u32.totalorder %s269_s15, %s368_s3 }
 0x118   :  { %p275_p9 = pnand %p273_p8, %p270_p7 }
 0x11a   :  { %278 = shalt.err (!%p275_p9)
}
 0x11b   :  { %172 = dma.vmem_to_hbm [thread:$0]  %s167_s12, 256, %s368_s3, [#allocation5], %s286_s22, %s286_s22, %s287_s23  }
 0x11c   :  { %283 = dma.done.wait [#allocation5], 256  }
 0x11d   :  { %284 = vsyncadd [#allocation5], 4294967040 }
 0x11e   :  { %176 = vsyncpa [#allocation4], 1 }
 0x11f   :  { %177 = vsyncpa [#allocation7], 1 }
 0x120   :  { %178 = vsyncpa [#allocation5], 1 }

</bundles_post_ra>
